<compile_context>
chip_gen: v6e
topology: v6e:2x2x1
jax: 0.10.0
libtpu: 0.0.40
codegen_flags: <defaults>
</compile_context>

<pallas_src>
import functools

import jax
import jax.numpy as jnp
from jax import lax
from jax.experimental import pallas as pl
from jax.experimental.pallas import tpu as pltpu


# ------------------------------ helpers ----------------------------------- #

def _round_up(v, m):
    return (v + m - 1) // m * m


def _vmem_budget_bytes():
    """~75% of physical VMEM (128 MiB v5e/v6e, 64 MiB v7x); safe fallback."""
    cap = 128 * 1024 * 1024
    try:
        cap = int(pltpu.get_tpu_info().vmem_capacity_bytes)
    except Exception:
        pass
    return int(cap * 3 // 4)


def _norm_unbiased(a, *, eps, inv_nm1):
    """(a - mean) / (std_unbiased + eps). Centered value reused for variance
    and output; divide replaced by pl.reciprocal (exact)."""
    c = a - jnp.mean(a, axis=0, keepdims=True)
    var = jnp.sum(c * c, axis=0, keepdims=True) * inv_nm1
    return c * pl.reciprocal(jnp.sqrt(var) + eps, approx=False)


# ----------------------------- Pallas kernels ------------------------------ #

def _eulersn_single_kernel(x_ref, w_ref, cx_ref, vt_ref, y_ref, *,
                           eps, inv_nm1, n_blocks):
    """All weights resident in VMEM; serial blocks as an unrolled fori_loop."""
    def body(i, y):
        y1 = _norm_unbiased(y, eps=eps, inv_nm1=inv_nm1)
        pre = jnp.dot(y1, w_ref[i], preferred_element_type=jnp.float32) + cx_ref[i]
        h = jnp.tanh(pre)
        return y + jnp.dot(h, vt_ref[i], preferred_element_type=jnp.float32)

    y_ref[...] = lax.fori_loop(0, n_blocks, body, x_ref[...], unroll=True)


def _eulersn_grid_kernel(x_ref, w_ref, cx_ref, vt_ref, y_ref, y1_ref, *,
                         eps, inv_nm1):
    """Grid (B, D_r tiles): y is a resident accumulator, weights streamed.

    The D_r tiling is exact because tanh is elementwise: each tile computes
    tanh(y1 @ W_tile + cx_tile) @ V_tile and accumulates into y.
    """
    i = pl.program_id(0)
    r = pl.program_id(1)

    @pl.when((i == 0) & (r == 0))
    def _():
        y_ref[...] = x_ref[...]

    @pl.when(r == 0)                       # y1 frozen for all D_r tiles of block i
    def _():
        y1_ref[...] = _norm_unbiased(y_ref[...], eps=eps, inv_nm1=inv_nm1)

    h = jnp.tanh(jnp.dot(y1_ref[...], w_ref[...],
                         preferred_element_type=jnp.float32) + cx_ref[...])
    y_ref[...] = y_ref[...] + jnp.dot(h, vt_ref[...],
                                      preferred_element_type=jnp.float32)


# --------------------------- one-time weight prep --------------------------- #

def prepare_eulersn_weights(Wt, bW, Ut, bU, Vt, *, alpha=0.9):
    """One-time (per model) packing: lane-pad to multiples of 128, pre-scale
    by alpha, fold the two biases.  Call once and reuse across forward calls
    (doing this per call would re-read every weight in HBM each time).

    Wt : (B, D, D_r)   inner_W[i].weight.T      bW : (B, D_r)
    Ut : (B, D, D_r)   inner_U[i].weight.T      bU : (B, D_r)
    Vt : (B, D_r, D)   outer[i].weight.T
    """
    B, D, D_r = Wt.shape
    Dp, D_rp = _round_up(D, 128), _round_up(D_r, 128)

    def pad2(a, r, c):
        a = a.astype(jnp.float32)
        return jnp.pad(a, ((0, 0), (0, r - a.shape[1]), (0, c - a.shape[2])))

    W = alpha * pad2(Wt, Dp, D_rp)                       # acts on y1 (in-kernel)
    U = (1.0 - alpha) * pad2(Ut, Dp, D_rp)               # acts on x1 (host einsum)
    bC = (alpha * bW.astype(jnp.float32) + (1.0 - alpha) * bU.astype(jnp.float32))
    bC = jnp.pad(bC, ((0, 0), (0, D_rp - D_r))).reshape(B, 1, D_rp)
    V = pad2(Vt, D_rp, Dp)
    return dict(W=W, U=U, bC=bC, V=V, B=B, D=D, D_r=D_r, Dp=Dp, D_rp=D_rp,
                alpha=float(alpha))


# ------------------------------- forward ------------------------------------ #

def eulersn_forward(x, params, *, eps=1e-5, path=None):
    """Pallas implementation of EulerSN.forward. x: (N, D) float32."""
    N, D = x.shape
    assert D == params["D"], "feature dim mismatch with prepared weights"
    assert N >= 2, "unbiased std needs N >= 2 (same restriction as the reference)"
    assert eps > 0.0, "eps > 0 required (padded zero-variance cols scale by 1/eps)"

    B, Dp, D_rp = params["B"], params["Dp"], params["D_rp"]
    x = x.astype(jnp.float32)
    x_p = jnp.pad(x, ((0, 0), (0, Dp - D)))

    # Constant x1 contribution, hoisted off the serial loop and weight stream:
    #   cx[i] = x1 @ ((1-alpha)*Ut[i]) + (1-alpha)*bU[i] + alpha*bW[i]
    x1 = (x - jnp.mean(x, axis=0, keepdims=True)) / (
        jnp.std(x, axis=0, ddof=1, keepdims=True) + eps)
    x1_p = jnp.pad(x1, ((0, 0), (0, Dp - D)))
    cx = jnp.einsum("nd,bdr->bnr", x1_p, params["U"],
                    preferred_element_type=jnp.float32) + params["bC"]   # (B,N,D_rp)

    inv_nm1 = 1.0 / float(N - 1)
    vmem_budget = _vmem_budget_bytes()

    # Single-path working set: everything resident, no double-buffering.
    single_bytes = 4 * (2 * N * Dp                       # x, y
                        + B * Dp * D_rp                  # alpha*Wt
                        + B * N * D_rp                   # cx
                        + B * D_rp * Dp                  # Vt
                        + 4 * N * (Dp + D_rp))           # live intermediates
    if path is None:
        path = "single" if single_bytes <= vmem_budget else "grid"

    if path == "single":
        kernel = functools.partial(_eulersn_single_kernel,
                                   eps=eps, inv_nm1=inv_nm1, n_blocks=B)
        y_p = pl.pallas_call(
            kernel,
            out_shape=jax.ShapeDtypeStruct((N, Dp), jnp.float32),
            compiler_params=pltpu.CompilerParams(vmem_limit_bytes=vmem_budget),
        )(x_p, params["W"], cx, params["V"])
    else:
        # Tile D_r so the double-buffered streamed weights fit every generation
        # (notably v7x's 64 MiB VMEM).
        fixed = 4 * (3 * N * Dp)                         # x + y + y1 (resident)
        tr = 128
        for cand in (2048, 1024, 512, 256, 128):
            if D_rp % cand:
                continue
            per_step = 2 * 4 * (Dp * cand + N * cand + cand * Dp)   # double-buffered
            if fixed + per_step <= vmem_budget // 2:
                tr = cand
                break
        n_r = D_rp // tr

        kernel = functools.partial(_eulersn_grid_kernel, eps=eps, inv_nm1=inv_nm1)
        y_p = pl.pallas_call(
            kernel,
            out_shape=jax.ShapeDtypeStruct((N, Dp), jnp.float32),
            grid=(B, n_r),
            in_specs=[
                pl.BlockSpec((N, Dp), lambda i, r: (0, 0)),            # x (resident)
                pl.BlockSpec((None, Dp, tr), lambda i, r: (i, 0, r)),  # alpha*Wt tile
                pl.BlockSpec((None, N, tr), lambda i, r: (i, 0, r)),   # cx tile
                pl.BlockSpec((None, tr, Dp), lambda i, r: (i, r, 0)),  # Vt tile
            ],
            out_specs=pl.BlockSpec((N, Dp), lambda i, r: (0, 0)),      # y resident acc
            scratch_shapes=[pltpu.VMEM((N, Dp), jnp.float32)],         # y1 per block
            compiler_params=pltpu.CompilerParams(
                dimension_semantics=("arbitrary", "arbitrary"),        # serial B / acc
                vmem_limit_bytes=vmem_budget),
        )(x_p, params["W"], cx, params["V"])

    return y_p[:, :D]


# --------------------------- pure-JAX reference ---------------------------- #

def eulersn_ref(x, Wt, bW, Ut, bU, Vt, *, alpha=0.9, eps=1e-5):
    def norm(a):
        return (a - a.mean(axis=0)) / (a.std(axis=0, ddof=1) + eps)  # torch.std unbiased

    y = x
    x1 = norm(x)
    for i in range(Wt.shape[0]):
        y1 = norm(y)
        h = jnp.tanh(alpha * (y1 @ Wt[i] + bW[i]) + (1 - alpha) * (x1 @ Ut[i] + bU[i]))
        y = y + h @ Vt[i]
    return y


# ---------------------------------- main ----------------------------------- #

if __name__ == "__main__":
    N, D, D_r, B = 8, 32, 64, 3
    alpha, eps = 0.9, 1e-5

    key = jax.random.PRNGKey(0)
    kx, kw, kbw, ku, kbu, kv = jax.random.split(key, 6)

    x = jax.random.normal(kx, (N, D), dtype=jnp.float32)

    w_scale = 1.0 / jnp.sqrt(jnp.float32(D))
    v_scale = 1.0 / jnp.sqrt(jnp.float32(D_r))
    Wt = jax.random.normal(kw, (B, D, D_r), dtype=jnp.float32) * w_scale
    bW = jax.random.normal(kbw, (B, D_r), dtype=jnp.float32) * w_scale
    Ut = jax.random.normal(ku, (B, D, D_r), dtype=jnp.float32) * w_scale
    bU = jax.random.normal(kbu, (B, D_r), dtype=jnp.float32) * w_scale
    Vt = jax.random.normal(kv, (B, D_r, D), dtype=jnp.float32) * v_scale

    y_ref_val = jax.block_until_ready(
        eulersn_ref(x, Wt, bW, Ut, bU, Vt, alpha=alpha, eps=eps))

    # One-time weight packing (hoisted out of the per-call path).
    params = jax.tree_util.tree_map(jax.block_until_ready,
                                    prepare_eulersn_weights(Wt, bW, Ut, bU, Vt,
                                                            alpha=alpha))

    # Single-invocation fused path (auto-selected at these sizes).
    y_single = jax.block_until_ready(
        eulersn_forward(x, params, eps=eps, path="single"))
    assert y_single.shape == (N, D)
    assert jnp.allclose(y_single, y_ref_val, rtol=1e-4, atol=1e-4), (
        f"single path max abs err = {jnp.max(jnp.abs(y_single - y_ref_val))}")

    # Grid-over-(B, D_r-tiles) fallback path (used when weights exceed VMEM).
    y_grid = jax.block_until_ready(
        eulersn_forward(x, params, eps=eps, path="grid"))
    assert jnp.allclose(y_grid, y_ref_val, rtol=1e-4, atol=1e-4), (
        f"grid path max abs err = {jnp.max(jnp.abs(y_grid - y_ref_val))}")

    # Auto path selection sanity check.
    y_auto = jax.block_until_ready(eulersn_forward(x, params, eps=eps))
    assert jnp.allclose(y_auto, y_ref_val, rtol=1e-4, atol=1e-4)

    print("KERNEL_OK")
</pallas_src>

<mosaic_0001>
module attributes {stable_mosaic.version = 11 : i64} {
  func.func @_eulersn_single_kernel(%arg0: memref<8x128xf32, #tpu.memory_space<vmem>>, %arg1: memref<3x128x128xf32, #tpu.memory_space<vmem>>, %arg2: memref<3x8x128xf32, #tpu.memory_space<vmem>>, %arg3: memref<3x128x128xf32, #tpu.memory_space<vmem>>, %arg4: memref<8x128xf32, #tpu.memory_space<vmem>>) attributes {dimension_semantics = [], scalar_prefetch = 0 : i64, scratch_operands = 0 : i64, tpu.core_type = #tpu.core_type<tc>} {
    %c0 = arith.constant 0 : index
    %c0_0 = arith.constant 0 : index
    %0 = vector.load %arg0[%c0, %c0_0] : memref<8x128xf32, #tpu.memory_space<vmem>>, vector<8x128xf32>
    %c0_i32 = arith.constant 0 : i32
    %cst = arith.constant dense<0.000000e+00> : vector<128xf32>
    %1 = vector.multi_reduction <add>, %0, %cst [0] : vector<8x128xf32> to vector<128xf32>
    %2 = vector.shape_cast %1 : vector<128xf32> to vector<1x128xf32>
    %cst_1 = arith.constant 8.000000e+00 : f32
    %3 = vector.broadcast %cst_1 : f32 to vector<1x128xf32>
    %4 = arith.divf %2, %3 : vector<1x128xf32>
    %5 = vector.broadcast %4 : vector<1x128xf32> to vector<8x128xf32>
    %6 = arith.subf %0, %5 : vector<8x128xf32>
    %7 = arith.mulf %6, %6 : vector<8x128xf32>
    %cst_2 = arith.constant dense<0.000000e+00> : vector<128xf32>
    %8 = vector.multi_reduction <add>, %7, %cst_2 [0] : vector<8x128xf32> to vector<128xf32>
    %9 = vector.shape_cast %8 : vector<128xf32> to vector<1x128xf32>
    %cst_3 = arith.constant 0.142857149 : f32
    %10 = vector.broadcast %cst_3 : f32 to vector<1x128xf32>
    %11 = arith.mulf %9, %10 : vector<1x128xf32>
    %12 = math.sqrt %11 : vector<1x128xf32>
    %cst_4 = arith.constant 9.99999974E-6 : f32
    %13 = vector.broadcast %cst_4 : f32 to vector<1x128xf32>
    %14 = arith.addf %12, %13 : vector<1x128xf32>
    %15 = tpu.reciprocal %14 : vector<1x128xf32> -> vector<1x128xf32>
    %16 = vector.broadcast %15 : vector<1x128xf32> to vector<8x128xf32>
    %17 = arith.mulf %6, %16 : vector<8x128xf32>
    %18 = arith.index_cast %c0_i32 : i32 to index
    %c0_5 = arith.constant 0 : index
    %c0_6 = arith.constant 0 : index
    %19 = vector.load %arg1[%18, %c0_5, %c0_6] : memref<3x128x128xf32, #tpu.memory_space<vmem>>, vector<1x128x128xf32>
    %20 = vector.shape_cast %19 : vector<1x128x128xf32> to vector<128x128xf32>
    %cst_7 = arith.constant dense<0.000000e+00> : vector<8x128xf32>
    %21 = tpu.matmul %17, %20, %cst_7 {dimension_numbers = #tpu.dot_dimension_numbers<[1], [0], [0], [1], [0, 0, 1, 1], [], []>} : vector<8x128xf32>, vector<128x128xf32>, vector<8x128xf32> -> vector<8x128xf32>
    %22 = arith.index_cast %c0_i32 : i32 to index
    %c0_8 = arith.constant 0 : index
    %c0_9 = arith.constant 0 : index
    %23 = vector.load %arg2[%22, %c0_8, %c0_9] : memref<3x8x128xf32, #tpu.memory_space<vmem>>, vector<1x8x128xf32>
    %24 = vector.shape_cast %23 : vector<1x8x128xf32> to vector<8x128xf32>
    %25 = arith.addf %21, %24 : vector<8x128xf32>
    %26 = math.tanh %25 : vector<8x128xf32>
    %27 = arith.index_cast %c0_i32 : i32 to index
    %c0_10 = arith.constant 0 : index
    %c0_11 = arith.constant 0 : index
    %28 = vector.load %arg3[%27, %c0_10, %c0_11] : memref<3x128x128xf32, #tpu.memory_space<vmem>>, vector<1x128x128xf32>
    %29 = vector.shape_cast %28 : vector<1x128x128xf32> to vector<128x128xf32>
    %cst_12 = arith.constant dense<0.000000e+00> : vector<8x128xf32>
    %30 = tpu.matmul %26, %29, %cst_12 {dimension_numbers = #tpu.dot_dimension_numbers<[1], [0], [0], [1], [0, 0, 1, 1], [], []>} : vector<8x128xf32>, vector<128x128xf32>, vector<8x128xf32> -> vector<8x128xf32>
    %31 = arith.addf %0, %30 : vector<8x128xf32>
    %c1_i32 = arith.constant 1 : i32
    %cst_13 = arith.constant dense<0.000000e+00> : vector<128xf32>
    %32 = vector.multi_reduction <add>, %31, %cst_13 [0] : vector<8x128xf32> to vector<128xf32>
    %33 = vector.shape_cast %32 : vector<128xf32> to vector<1x128xf32>
    %cst_14 = arith.constant 8.000000e+00 : f32
    %34 = vector.broadcast %cst_14 : f32 to vector<1x128xf32>
    %35 = arith.divf %33, %34 : vector<1x128xf32>
    %36 = vector.broadcast %35 : vector<1x128xf32> to vector<8x128xf32>
    %37 = arith.subf %31, %36 : vector<8x128xf32>
    %38 = arith.mulf %37, %37 : vector<8x128xf32>
    %cst_15 = arith.constant dense<0.000000e+00> : vector<128xf32>
    %39 = vector.multi_reduction <add>, %38, %cst_15 [0] : vector<8x128xf32> to vector<128xf32>
    %40 = vector.shape_cast %39 : vector<128xf32> to vector<1x128xf32>
    %cst_16 = arith.constant 0.142857149 : f32
    %41 = vector.broadcast %cst_16 : f32 to vector<1x128xf32>
    %42 = arith.mulf %40, %41 : vector<1x128xf32>
    %43 = math.sqrt %42 : vector<1x128xf32>
    %cst_17 = arith.constant 9.99999974E-6 : f32
    %44 = vector.broadcast %cst_17 : f32 to vector<1x128xf32>
    %45 = arith.addf %43, %44 : vector<1x128xf32>
    %46 = tpu.reciprocal %45 : vector<1x128xf32> -> vector<1x128xf32>
    %47 = vector.broadcast %46 : vector<1x128xf32> to vector<8x128xf32>
    %48 = arith.mulf %37, %47 : vector<8x128xf32>
    %49 = arith.index_cast %c1_i32 : i32 to index
    %c0_18 = arith.constant 0 : index
    %c0_19 = arith.constant 0 : index
    %50 = vector.load %arg1[%49, %c0_18, %c0_19] : memref<3x128x128xf32, #tpu.memory_space<vmem>>, vector<1x128x128xf32>
    %51 = vector.shape_cast %50 : vector<1x128x128xf32> to vector<128x128xf32>
    %cst_20 = arith.constant dense<0.000000e+00> : vector<8x128xf32>
    %52 = tpu.matmul %48, %51, %cst_20 {dimension_numbers = #tpu.dot_dimension_numbers<[1], [0], [0], [1], [0, 0, 1, 1], [], []>} : vector<8x128xf32>, vector<128x128xf32>, vector<8x128xf32> -> vector<8x128xf32>
    %53 = arith.index_cast %c1_i32 : i32 to index
    %c0_21 = arith.constant 0 : index
    %c0_22 = arith.constant 0 : index
    %54 = vector.load %arg2[%53, %c0_21, %c0_22] : memref<3x8x128xf32, #tpu.memory_space<vmem>>, vector<1x8x128xf32>
    %55 = vector.shape_cast %54 : vector<1x8x128xf32> to vector<8x128xf32>
    %56 = arith.addf %52, %55 : vector<8x128xf32>
    %57 = math.tanh %56 : vector<8x128xf32>
    %58 = arith.index_cast %c1_i32 : i32 to index
    %c0_23 = arith.constant 0 : index
    %c0_24 = arith.constant 0 : index
    %59 = vector.load %arg3[%58, %c0_23, %c0_24] : memref<3x128x128xf32, #tpu.memory_space<vmem>>, vector<1x128x128xf32>
    %60 = vector.shape_cast %59 : vector<1x128x128xf32> to vector<128x128xf32>
    %cst_25 = arith.constant dense<0.000000e+00> : vector<8x128xf32>
    %61 = tpu.matmul %57, %60, %cst_25 {dimension_numbers = #tpu.dot_dimension_numbers<[1], [0], [0], [1], [0, 0, 1, 1], [], []>} : vector<8x128xf32>, vector<128x128xf32>, vector<8x128xf32> -> vector<8x128xf32>
    %62 = arith.addf %31, %61 : vector<8x128xf32>
    %c2_i32 = arith.constant 2 : i32
    %cst_26 = arith.constant dense<0.000000e+00> : vector<128xf32>
    %63 = vector.multi_reduction <add>, %62, %cst_26 [0] : vector<8x128xf32> to vector<128xf32>
    %64 = vector.shape_cast %63 : vector<128xf32> to vector<1x128xf32>
    %cst_27 = arith.constant 8.000000e+00 : f32
    %65 = vector.broadcast %cst_27 : f32 to vector<1x128xf32>
    %66 = arith.divf %64, %65 : vector<1x128xf32>
    %67 = vector.broadcast %66 : vector<1x128xf32> to vector<8x128xf32>
    %68 = arith.subf %62, %67 : vector<8x128xf32>
    %69 = arith.mulf %68, %68 : vector<8x128xf32>
    %cst_28 = arith.constant dense<0.000000e+00> : vector<128xf32>
    %70 = vector.multi_reduction <add>, %69, %cst_28 [0] : vector<8x128xf32> to vector<128xf32>
    %71 = vector.shape_cast %70 : vector<128xf32> to vector<1x128xf32>
    %cst_29 = arith.constant 0.142857149 : f32
    %72 = vector.broadcast %cst_29 : f32 to vector<1x128xf32>
    %73 = arith.mulf %71, %72 : vector<1x128xf32>
    %74 = math.sqrt %73 : vector<1x128xf32>
    %cst_30 = arith.constant 9.99999974E-6 : f32
    %75 = vector.broadcast %cst_30 : f32 to vector<1x128xf32>
    %76 = arith.addf %74, %75 : vector<1x128xf32>
    %77 = tpu.reciprocal %76 : vector<1x128xf32> -> vector<1x128xf32>
    %78 = vector.broadcast %77 : vector<1x128xf32> to vector<8x128xf32>
    %79 = arith.mulf %68, %78 : vector<8x128xf32>
    %80 = arith.index_cast %c2_i32 : i32 to index
    %c0_31 = arith.constant 0 : index
    %c0_32 = arith.constant 0 : index
    %81 = vector.load %arg1[%80, %c0_31, %c0_32] : memref<3x128x128xf32, #tpu.memory_space<vmem>>, vector<1x128x128xf32>
    %82 = vector.shape_cast %81 : vector<1x128x128xf32> to vector<128x128xf32>
    %cst_33 = arith.constant dense<0.000000e+00> : vector<8x128xf32>
    %83 = tpu.matmul %79, %82, %cst_33 {dimension_numbers = #tpu.dot_dimension_numbers<[1], [0], [0], [1], [0, 0, 1, 1], [], []>} : vector<8x128xf32>, vector<128x128xf32>, vector<8x128xf32> -> vector<8x128xf32>
    %84 = arith.index_cast %c2_i32 : i32 to index
    %c0_34 = arith.constant 0 : index
    %c0_35 = arith.constant 0 : index
    %85 = vector.load %arg2[%84, %c0_34, %c0_35] : memref<3x8x128xf32, #tpu.memory_space<vmem>>, vector<1x8x128xf32>
    %86 = vector.shape_cast %85 : vector<1x8x128xf32> to vector<8x128xf32>
    %87 = arith.addf %83, %86 : vector<8x128xf32>
    %88 = math.tanh %87 : vector<8x128xf32>
    %89 = arith.index_cast %c2_i32 : i32 to index
    %c0_36 = arith.constant 0 : index
    %c0_37 = arith.constant 0 : index
    %90 = vector.load %arg3[%89, %c0_36, %c0_37] : memref<3x128x128xf32, #tpu.memory_space<vmem>>, vector<1x128x128xf32>
    %91 = vector.shape_cast %90 : vector<1x128x128xf32> to vector<128x128xf32>
    %cst_38 = arith.constant dense<0.000000e+00> : vector<8x128xf32>
    %92 = tpu.matmul %88, %91, %cst_38 {dimension_numbers = #tpu.dot_dimension_numbers<[1], [0], [0], [1], [0, 0, 1, 1], [], []>} : vector<8x128xf32>, vector<128x128xf32>, vector<8x128xf32> -> vector<8x128xf32>
    %93 = arith.addf %62, %92 : vector<8x128xf32>
    %c3_i32 = arith.constant 3 : i32
    %c0_39 = arith.constant 0 : index
    %c0_40 = arith.constant 0 : index
    %94 = vector.load %arg4[%c0_39, %c0_40] : memref<8x128xf32, #tpu.memory_space<vmem>>, vector<8x128xf32>
    tpu.vector_store %arg4[%c0_39, %c0_40], %93 {strides = array<i32>} : memref<8x128xf32, #tpu.memory_space<vmem>>, vector<8x128xf32>,
    return
  }
}

</mosaic_0001>

<bundles_post_ra>
// kernel: tpu_custom_call.1
= control target key start
LH: loop header
LB: loop body
LE: loop exit
PB: predicated region body
PF: predicated region fallthrough
CT: control target
= control target key end

     0   :  { %9 = vsyncpa [#allocation3], 0  ;;  %s1331_s0 = inlined_call_operand.hbm [shape: f32[8,128], index: 0, kind: input, shape index: {}]   ;;  %s1332_s1 = inlined_call_operand.hbm [shape: f32[3,128,128], index: 1, kind: input, shape index: {}]   ;;  %s1333_s2 = inlined_call_operand.hbm [shape: f32[3,8,128], index: 2, kind: input, shape index: {}]   ;;  %s1334_s3 = inlined_call_operand.hbm [shape: f32[3,128,128], index: 3, kind: input, shape index: {}]   ;;  %s1335_s4 = inlined_call_operand.hbm [shape: f32[8,128], index: 4, kind: output, shape index: {}]  }
   0x1   :  { %10 = vsyncpa [#allocation6], 0 }
   0x2   :  { %11 = vsyncpa [#allocation9], 0 }
   0x3   :  { %12 = vsyncpa [#allocation4], 0  ;;  %s1147_s15 = smov [#allocation5]  }
   0x4   :  { %s28_s16 = sshll.u32 %s1147_s15, 4  ;;  %s29_s16 = int_to_ptr.vmem [resolvable:$true] %s28_s16 }
   0x5   :  { %s1047_s17 = scalar_lea.vmem %s29_s16, 6144  ;;  %p1052_p1 = scmp.lt.s32.totalorder %s29_s16, %s29_s16 }
   0x6   :  { %p1048_p0 = scmp.ne.s32.totalorder %s29_s16, %s1047_s17  ;;  %p1053_p2 = scmp.lt.s32.totalorder %s1047_s17, %s1047_s17 }
   0x8   :  { %p1054_p3 = por %p1053_p2, %p1052_p1 }
   0xa   :  { %p1055_p4 = pnand %p1054_p3, %p1048_p0 }
   0xc   :  { %1058 = shalt.err (!%p1055_p4)
}
   0xd   :  { %s1148_s18 = smov 128   ;;  %s1149_s19 = smov 8  }
   0xe   :  { %34 = dma.hbm_to_vmem [thread:$0]  %s1332_s1, 6144, %s29_s16, [#allocation6], %s1148_s18, %s1148_s18, %s1149_s19  }
   0xf   :  { %s1150_s22 = smov [#allocation2]   ;;  %s1151_s24 = smov [#allocation7]  }
  0x10   :  { %s19_s23 = sshll.u32 %s1150_s22, 4  ;;  %s40_s25 = sshll.u32 %s1151_s24, 4  ;;  %s20_s23 = int_to_ptr.vmem [resolvable:$true] %s19_s23  ;;  %s41_s25 = int_to_ptr.vmem [resolvable:$true] %s40_s25 }
  0x11   :  { %s1067_s26 = scalar_lea.vmem %s20_s23, 128  ;;  %p1072_p6 = scmp.lt.s32.totalorder %s20_s23, %s20_s23 }
  0x12   :  { %p1068_p5 = scmp.ne.s32.totalorder %s20_s23, %s1067_s26  ;;  %p1073_p7 = scmp.lt.s32.totalorder %s1067_s26, %s1067_s26 }
  0x14   :  { %p1074_p8 = por %p1073_p7, %p1072_p6 }
  0x16   :  { %p1075_p9 = pnand %p1074_p8, %p1068_p5 }
  0x18   :  { %1078 = shalt.err (!%p1075_p9)
}
  0x19   :  { %22 = dma.hbm_to_vmem [thread:$0]  %s1331_s0, 128, %s20_s23, [#allocation3]  }
  0x1a   :  { %s1087_s29 = scalar_lea.vmem %s41_s25, 384  ;;  %p1092_p11 = scmp.lt.s32.totalorder %s41_s25, %s41_s25 }
  0x1b   :  { %p1088_p10 = scmp.ne.s32.totalorder %s41_s25, %s1087_s29  ;;  %p1093_p12 = scmp.lt.s32.totalorder %s1087_s29, %s1087_s29 }
  0x1d   :  { %p1094_p13 = por %p1093_p12, %p1092_p11 }
  0x1f   :  { %p1095_p0 = pnand %p1094_p13, %p1088_p10 }
  0x21   :  { %1098 = shalt.err (!%p1095_p0)
}
  0x22   :  { %46 = dma.hbm_to_vmem [thread:$0]  %s1333_s2, 384, %s41_s25, [#allocation6], %s1148_s18, %s1148_s18, %s1149_s19  }
  0x23   :  { %s1152_s5 = smov [#allocation8]  }
  0x24   :  { %s52_s6 = sshll.u32 %s1152_s5, 4  ;;  %s53_s6 = int_to_ptr.vmem [resolvable:$true] %s52_s6 }
  0x25   :  { %s1107_s7 = scalar_lea.vmem %s53_s6, 6144  ;;  %p1112_p2 = scmp.lt.s32.totalorder %s53_s6, %s53_s6 }
  0x26   :  { %p1108_p1 = scmp.ne.s32.totalorder %s53_s6, %s1107_s7  ;;  %p1113_p3 = scmp.lt.s32.totalorder %s1107_s7, %s1107_s7 }
  0x28   :  { %p1114_p4 = por %p1113_p3, %p1112_p2 }
  0x2a   :  { %p1115_p5 = pnand %p1114_p4, %p1108_p1 }
  0x2c   :  { %1118 = shalt.err (!%p1115_p5)
}
  0x2d   :  { %58 = dma.hbm_to_vmem [thread:$0]  %s1334_s3, 6144, %s53_s6, [#allocation9], %s1148_s18, %s1148_s18, %s1149_s19  }
  0x2e   :  { %1139 = dma.done.wait [#allocation3], 128  }
  0x2f   :  { %1140 = vsyncadd [#allocation3], 4294967168 }
  0x30   :  { %1141 = dma.done.wait [#allocation6], 6528  }
  0x31   :  { %1142 = vsyncadd [#allocation6], 4294960768 }
  0x32   :  { %1143 = dma.done.wait [#allocation9], 6144  }
  0x33   :  { %1144 = vsyncadd [#allocation9], 4294961152  ;;  %v1153_v0 = vmov 0.0   ;;  %vm1154_vm0 = vmmov 0   ;;  %v114_v1 = vld [vmem:[#allocation5 + $0x78] sm:$0xff]  ;;  %v113_v2 = vld [vmem:[#allocation5 + $0x70] sm:$0xff] }
  0x34   :  { %802 = vmatprep.subr.mxu0 %v1153_v0  ;;  %834 = vmatprep.mubr.msk.f32.mxu0 %vm1154_vm0, %v1153_v0  ;;  %v112_v3 = vld [vmem:[#allocation5 + $0x68] sm:$0xff]  ;;  %v111_v4 = vld [vmem:[#allocation5 + $0x60] sm:$0xff]  ;;  %v1210_v5 = vld [vmem:[#allocation2] sm:$0xff]  ;;  %s1155_s2 = smov [#allocation10]  }
  0x35   :  { %837 = vmatprep.subr.mxu1 %v1153_v0  ;;  %869 = vmatprep.mubr.msk.f32.mxu1 %vm1154_vm0, %v1153_v0  ;;  %v202_v6 = vld [vmem:[#allocation8 + $0x78] sm:$0xff]  ;;  %v110_v7 = vld [vmem:[#allocation5 + $0x58] sm:$0xff]  ;;  %v72_v8 = vrot.slane %v1210_v5, 4  ;;  %v201_v9 = vld [vmem:[#allocation8 + $0x70] sm:$0xff]  ;;  %s689_s3 = sshll.u32 %s1155_s2, 4  ;;  %s690_s3 = int_to_ptr.vmem [resolvable:$true] %s689_s3 }
  0x36   :  { %803 = vmatpush3.msra.mxu0 %v114_v1  ;;  %838 = vmatpush3.msra.mxu1 %v202_v6  ;;  %v200_v10 = vld [vmem:[#allocation8 + $0x68] sm:$0xff]  ;;  %v109_v11 = vld [vmem:[#allocation5 + $0x50] sm:$0xff]  ;;  %v199_v13 = vld [vmem:[#allocation8 + $0x60] sm:$0xff]  ;;  %s1119_s9 = scalar_lea.vmem %s690_s3, 128  ;;  %p1124_p7 = scmp.lt.s32.totalorder %s690_s3, %s690_s3 }
  0x37   :  { %804 = vmatprep.subr.mxu0 %v1153_v0  ;;  %839 = vmatprep.subr.mxu1 %v1153_v0  ;;  %v73_v12 = vadd.f32 %v72_v8, %v1210_v5  ;;  %v108_v14 = vld [vmem:[#allocation5 + $0x48] sm:$0xff]  ;;  %v198_v16 = vld [vmem:[#allocation8 + $0x58] sm:$0xff]  ;;  %v107_v17 = vld [vmem:[#allocation5 + $0x40] sm:$0xff]  ;;  %p1120_p6 = scmp.ne.s32.totalorder %s690_s3, %s1119_s9  ;;  %p1125_p8 = scmp.lt.s32.totalorder %s1119_s9, %s1119_s9 }
  0x38   :  { %805 = vmatpush3.msra.mxu0 %v113_v2  ;;  %840 = vmatpush3.msra.mxu1 %v201_v9  ;;  %v197_v19 = vld [vmem:[#allocation8 + $0x50] sm:$0xff]  ;;  %v106_v20 = vld [vmem:[#allocation5 + $0x38] sm:$0xff]  ;;  %v196_v22 = vld [vmem:[#allocation8 + $0x48] sm:$0xff] }
  0x39   :  { %806 = vmatprep.subr.mxu0 %v1153_v0  ;;  %841 = vmatprep.subr.mxu1 %v1153_v0  ;;  %v74_v15 = vrot.slane %v73_v12, 2  ;;  %v105_v23 = vld [vmem:[#allocation5 + $0x30] sm:$0xff]  ;;  %v104_v25 = vld [vmem:[#allocation5 + $0x28] sm:$0xff]  ;;  %v103_v27 = vld [vmem:[#allocation5 + $0x20] sm:$0xff]  ;;  %p1126_p9 = por %p1125_p8, %p1124_p7 }
  0x3a   :  { %807 = vmatpush3.msra.mxu0 %v112_v3  ;;  %842 = vmatpush3.msra.mxu1 %v200_v10  ;;  %v102_v29 = vld [vmem:[#allocation5 + $0x18] sm:$0xff]  ;;  %v101_v31 = vld [vmem:[#allocation5 + $0x10] sm:$0xff]  ;;  %v100_v33 = vld [vmem:[#allocation5 + $0x8] sm:$0xff] }
  0x3b   :  { %808 = vmatprep.subr.mxu0 %v1153_v0  ;;  %843 = vmatprep.subr.mxu1 %v1153_v0  ;;  %v75_v18 = vadd.f32 %v74_v15, %v73_v12  ;;  %v99_v35 = vld [vmem:[#allocation5] sm:$0xff]  ;;  %v195_v49 = vld [vmem:[#allocation8 + $0x40] sm:$0xff]  ;;  %v194_v50 = vld [vmem:[#allocation8 + $0x38] sm:$0xff]  ;;  %p1127_p10 = pnand %p1126_p9, %p1120_p6 }
  0x3c   :  { %809 = vmatpush3.msra.mxu0 %v111_v4  ;;  %844 = vmatpush3.msra.mxu1 %v199_v13  ;;  %v193_v51 = vld [vmem:[#allocation8 + $0x30] sm:$0xff]  ;;  %v192_v52 = vld [vmem:[#allocation8 + $0x28] sm:$0xff]  ;;  %v191_v53 = vld [vmem:[#allocation8 + $0x20] sm:$0xff] }
  0x3d   :  { %810 = vmatprep.subr.mxu0 %v1153_v0  ;;  %845 = vmatprep.subr.mxu1 %v1153_v0  ;;  %v76_v21 = vrot.slane %v75_v18, 1  ;;  %v190_v54 = vld [vmem:[#allocation8 + $0x18] sm:$0xff]  ;;  %v189_v55 = vld [vmem:[#allocation8 + $0x10] sm:$0xff]  ;;  %v188_v56 = vld [vmem:[#allocation8 + $0x8] sm:$0xff] }
  0x3e   :  { %811 = vmatpush3.msra.mxu0 %v110_v7  ;;  %846 = vmatpush3.msra.mxu1 %v198_v16  ;;  %v187_v57 = vld [vmem:[#allocation8] sm:$0xff]  ;;  %v115_v58 = vld [vmem:[#allocation7] sm:$0xff]  ;;  %v315_v1 = vld [vmem:[#allocation5 + $0xf0] sm:$0xff] }
  0x3f   :  { %812 = vmatprep.subr.mxu0 %v1153_v0  ;;  %847 = vmatprep.subr.mxu1 %v1153_v0  ;;  %v77_v24 = vadd.f32 %v76_v21, %v75_v18  ;;  %v316_v63 = vld [vmem:[#allocation5 + $0xf8] sm:$0xff]  ;;  %v314_v2 = vld [vmem:[#allocation5 + $0xe8] sm:$0xff]  ;;  %v313_v3 = vld [vmem:[#allocation5 + $0xe0] sm:$0xff] }
  0x40   :  { %813 = vmatpush3.msra.mxu0 %v109_v11  ;;  %848 = vmatpush3.msra.mxu1 %v197_v19  ;;  %v312_v4 = vld [vmem:[#allocation5 + $0xd8] sm:$0xff]  ;;  %v311_v6 = vld [vmem:[#allocation5 + $0xd0] sm:$0xff]  ;;  %v310_v7 = vld [vmem:[#allocation5 + $0xc8] sm:$0xff] }
  0x41   :  { %814 = vmatprep.subr.mxu0 %v1153_v0  ;;  %849 = vmatprep.subr.mxu1 %v1153_v0  ;;  %v79_v26 = vmul.f32 0.125, %v77_v24  ;;  %v309_v8 = vld [vmem:[#allocation5 + $0xc0] sm:$0xff]  ;;  %v308_v9 = vld [vmem:[#allocation5 + $0xb8] sm:$0xff]  ;;  %v307_v10 = vld [vmem:[#allocation5 + $0xb0] sm:$0xff] }
  0x42   :  { %815 = vmatpush3.msra.mxu0 %v108_v14  ;;  %850 = vmatpush3.msra.mxu1 %v196_v22  ;;  %v306_v11 = vld [vmem:[#allocation5 + $0xa8] sm:$0xff]  ;;  %v305_v12 = vld [vmem:[#allocation5 + $0xa0] sm:$0xff]  ;;  %v304_v13 = vld [vmem:[#allocation5 + $0x98] sm:$0xff] }
  0x43   :  { %816 = vmatprep.subr.mxu0 %v1153_v0  ;;  %851 = vmatprep.subr.mxu1 %v1153_v0  ;;  %v80_v28 = vsub.f32 %v1210_v5, %v79_v26  ;;  %v303_v14 = vld [vmem:[#allocation5 + $0x90] sm:$0xff]  ;;  %v302_v15 = vld [vmem:[#allocation5 + $0x88] sm:$0xff]  ;;  %v301_v16 = vld [vmem:[#allocation5 + $0x80] sm:$0xff] }
  0x44   :  { %817 = vmatpush3.msra.mxu0 %v107_v17  ;;  %852 = vmatpush3.msra.mxu1 %v195_v49  ;;  %v406_v17 = vld [vmem:[#allocation8 + $0xf8] sm:$0xff]  ;;  %v405_v18 = vld [vmem:[#allocation8 + $0xf0] sm:$0xff]  ;;  %v404_v19 = vld [vmem:[#allocation8 + $0xe8] sm:$0xff] }
  0x45   :  { %818 = vmatprep.subr.mxu0 %v1153_v0  ;;  %v81_v30 = vmul.f32 %v80_v28, %v80_v28  ;;  %853 = vmatprep.subr.mxu1 %v1153_v0  ;;  %v402_v21 = vld [vmem:[#allocation8 + $0xd8] sm:$0xff]  ;;  %v401_v22 = vld [vmem:[#allocation8 + $0xd0] sm:$0xff] }
  0x46   :  { %819 = vmatpush3.msra.mxu0 %v106_v20  ;;  %854 = vmatpush3.msra.mxu1 %v194_v50  ;;  %v403_v20 = vld [vmem:[#allocation8 + $0xe0] sm:$0xff] }
  0x47   :  { %820 = vmatprep.subr.mxu0 %v1153_v0  ;;  %v82_v32 = vrot.slane %v81_v30, 4  ;;  %855 = vmatprep.subr.mxu1 %v1153_v0  ;;  %v399_v50 = vld [vmem:[#allocation8 + $0xc0] sm:$0xff] }
  0x48   :  { %821 = vmatpush3.msra.mxu0 %v105_v23  ;;  %856 = vmatpush3.msra.mxu1 %v193_v51  ;;  %v400_v23 = vld [vmem:[#allocation8 + $0xc8] sm:$0xff]  ;;  %v398_v51 = vld [vmem:[#allocation8 + $0xb8] sm:$0xff] }
  0x49   :  { %822 = vmatprep.subr.mxu0 %v1153_v0  ;;  %v83_v34 = vadd.f32 %v82_v32, %v81_v30  ;;  %857 = vmatprep.subr.mxu1 %v1153_v0 }
  0x4a   :  { %823 = vmatpush3.msra.mxu0 %v104_v25  ;;  %858 = vmatpush3.msra.mxu1 %v192_v52  ;;  %v397_v52 = vld [vmem:[#allocation8 + $0xb0] sm:$0xff] }
  0x4b   :  { %824 = vmatprep.subr.mxu0 %v1153_v0  ;;  %v84_v36 = vrot.slane %v83_v34, 2  ;;  %859 = vmatprep.subr.mxu1 %v1153_v0 }
  0x4c   :  { %825 = vmatpush3.msra.mxu0 %v103_v27  ;;  %860 = vmatpush3.msra.mxu1 %v191_v53  ;;  %v396_v53 = vld [vmem:[#allocation8 + $0xa8] sm:$0xff] }
  0x4d   :  { %826 = vmatprep.subr.mxu0 %v1153_v0  ;;  %v85_v37 = vadd.f32 %v84_v36, %v83_v34  ;;  %861 = vmatprep.subr.mxu1 %v1153_v0 }
  0x4e   :  { %827 = vmatpush3.msra.mxu0 %v102_v29  ;;  %862 = vmatpush3.msra.mxu1 %v190_v54  ;;  %v395_v54 = vld [vmem:[#allocation8 + $0xa0] sm:$0xff] }
  0x4f   :  { %828 = vmatprep.subr.mxu0 %v1153_v0  ;;  %v86_v38 = vrot.slane %v85_v37, 1  ;;  %863 = vmatprep.subr.mxu1 %v1153_v0 }
  0x50   :  { %829 = vmatpush3.msra.mxu0 %v101_v31  ;;  %864 = vmatpush3.msra.mxu1 %v189_v55  ;;  %v394_v55 = vld [vmem:[#allocation8 + $0x98] sm:$0xff] }
  0x51   :  { %830 = vmatprep.subr.mxu0 %v1153_v0  ;;  %v87_v39 = vadd.f32 %v86_v38, %v85_v37  ;;  %865 = vmatprep.subr.mxu1 %v1153_v0 }
  0x52   :  { %831 = vmatpush3.msra.mxu0 %v100_v33  ;;  %866 = vmatpush3.msra.mxu1 %v188_v56  ;;  %v393_v56 = vld [vmem:[#allocation8 + $0x90] sm:$0xff] }
  0x53   :  { %832 = vmatprep.subr.mxu0 %v1153_v0  ;;  %v88_v40 = vmul.f32 0.14285715, %v87_v39  ;;  %867 = vmatprep.subr.mxu1 %v1153_v0 }
  0x54   :  { %833 = vmatpush3.msra.mxu0 %v99_v35  ;;  %868 = vmatpush3.msra.mxu1 %v187_v57  ;;  %v392_v57 = vld [vmem:[#allocation8 + $0x88] sm:$0xff] }
  0x55   :  { %872 = vmatprep.subr.mxu0 %v1153_v0  ;;  %1021 = vrsqrt.f32 %v88_v40  ;;  %vm91_vm1 = vcmp.eq.f32.partialorder %v88_v40, inf  ;;  %v94_v42 = vand.u32 2147483648, %v88_v40  ;;  %vm93_vm2 = vcmp.eq.f32.partialorder %v88_v40, 0.0  ;;  %907 = vmatprep.subr.mxu1 %v1153_v0 }
  0x62   :  { %v1022_v41 = vpop.eup %1021 }
  0x63   :  { %v90_v43 = vmul.f32 %v1022_v41, %v88_v40 }
  0x65   :  { %v92_v44 = vsel %vm91_vm1, %v88_v40, %v90_v43 }
  0x66   :  { %v95_v45 = vsel %vm93_vm2, %v94_v42, %v92_v44 }
  0x67   :  { %v96_v46 = vadd.f32 1e-05, %v95_v45 }
  0x69   :  { %1023 = vrcp.f32 %v96_v46 }
  0x76   :  { %v1024_v47 = vpop.eup %1023 }
  0x77   :  { %v98_v48 = vmul.f32 %v1024_v47, %v80_v28 }
  0x79   :  { %835 = vmatmul.mubr.f32.vlgmr.msra.gmra.mxu0 %v98_v48 }
  0x7a   :  { %904 = vmatprep.mubr.msk.f32.mxu0 %vm1154_vm0, %v1153_v0  ;;  %873 = vmatpush3.msra.mxu0 %v316_v63 }
  0x7b   :  { %874 = vmatprep.subr.mxu0 %v1153_v0 }
  0x7c   :  { %875 = vmatpush3.msra.mxu0 %v315_v1  ;;  %v520_v1 = vld [vmem:[#allocation5 + $0x178] sm:$0xff] }
  0x7d   :  { %876 = vmatprep.subr.mxu0 %v1153_v0 }
  0x7e   :  { %877 = vmatpush3.msra.mxu0 %v314_v2  ;;  %v519_v2 = vld [vmem:[#allocation5 + $0x170] sm:$0xff] }
  0x7f   :  { %878 = vmatprep.subr.mxu0 %v1153_v0 }
  0x80   :  { %879 = vmatpush3.msra.mxu0 %v313_v3  ;;  %v518_v3 = vld [vmem:[#allocation5 + $0x168] sm:$0xff] }
  0x81   :  { %880 = vmatprep.subr.mxu0 %v1153_v0 }
  0x82   :  { %881 = vmatpush3.msra.mxu0 %v312_v4  ;;  %v517_v4 = vld [vmem:[#allocation5 + $0x160] sm:$0xff] }
  0x83   :  { %882 = vmatprep.subr.mxu0 %v1153_v0 }
  0x84   :  { %883 = vmatpush3.msra.mxu0 %v311_v6  ;;  %v516_v6 = vld [vmem:[#allocation5 + $0x158] sm:$0xff] }
  0x85   :  { %884 = vmatprep.subr.mxu0 %v1153_v0 }
  0x86   :  { %885 = vmatpush3.msra.mxu0 %v310_v7  ;;  %v515_v7 = vld [vmem:[#allocation5 + $0x150] sm:$0xff] }
  0x87   :  { %886 = vmatprep.subr.mxu0 %v1153_v0 }
  0x88   :  { %887 = vmatpush3.msra.mxu0 %v309_v8  ;;  %v514_v8 = vld [vmem:[#allocation5 + $0x148] sm:$0xff] }
  0x89   :  { %888 = vmatprep.subr.mxu0 %v1153_v0 }
  0x8a   :  { %889 = vmatpush3.msra.mxu0 %v308_v9  ;;  %v513_v9 = vld [vmem:[#allocation5 + $0x140] sm:$0xff] }
  0x8b   :  { %890 = vmatprep.subr.mxu0 %v1153_v0 }
  0x8c   :  { %891 = vmatpush3.msra.mxu0 %v307_v10  ;;  %v512_v10 = vld [vmem:[#allocation5 + $0x138] sm:$0xff] }
  0x8d   :  { %892 = vmatprep.subr.mxu0 %v1153_v0 }
  0x8e   :  { %893 = vmatpush3.msra.mxu0 %v306_v11  ;;  %v511_v11 = vld [vmem:[#allocation5 + $0x130] sm:$0xff] }
  0x8f   :  { %894 = vmatprep.subr.mxu0 %v1153_v0 }
  0x90   :  { %895 = vmatpush3.msra.mxu0 %v305_v12  ;;  %v510_v12 = vld [vmem:[#allocation5 + $0x128] sm:$0xff] }
  0x91   :  { %896 = vmatprep.subr.mxu0 %v1153_v0 }
  0x92   :  { %897 = vmatpush3.msra.mxu0 %v304_v13  ;;  %v509_v13 = vld [vmem:[#allocation5 + $0x120] sm:$0xff] }
  0x93   :  { %898 = vmatprep.subr.mxu0 %v1153_v0 }
  0x94   :  { %899 = vmatpush3.msra.mxu0 %v303_v14  ;;  %v508_v14 = vld [vmem:[#allocation5 + $0x118] sm:$0xff] }
  0x95   :  { %900 = vmatprep.subr.mxu0 %v1153_v0 }
  0x96   :  { %901 = vmatpush3.msra.mxu0 %v302_v15  ;;  %v507_v15 = vld [vmem:[#allocation5 + $0x110] sm:$0xff] }
  0x97   :  { %902 = vmatprep.subr.mxu0 %v1153_v0 }
  0x98   :  { %903 = vmatpush3.msra.mxu0 %v301_v16  ;;  %v506_v16 = vld [vmem:[#allocation5 + $0x108] sm:$0xff] }
  0x99   :  { %942 = vmatprep.subr.mxu0 %v1153_v0 }
 0x139   :  { %v182_v59 = vpop.f32.mrf.mxu0 }
 0x13a   :  { %v183_v60 = vadd.f32 %v182_v59, %v115_v58  ;;  %v391_v58 = vld [vmem:[#allocation8 + $0x80] sm:$0xff]  ;;  %v318_v59 = vld [vmem:[#allocation7 + $0x8] sm:$0xff] }
 0x13b   :  { %v836_v61 = vpop.f32.mrf.mxu0 }
 0x13c   :  { %1025 = vtanh.f32 %v183_v60 }
 0x149   :  { %v1026_v62 = vpop.eup %1025 }
 0x14a   :  { %870 = vmatmul.mubr.f32.vlgmr.msra.gmra.mxu1 %v1026_v62 }
 0x14b   :  { %939 = vmatprep.mubr.msk.f32.mxu1 %vm1154_vm0, %v1153_v0  ;;  %908 = vmatpush3.msra.mxu1 %v406_v17  ;;  %v505_v17 = vld [vmem:[#allocation5 + $0x100] sm:$0xff] }
 0x14c   :  { %909 = vmatprep.subr.mxu1 %v1153_v0 }
 0x14d   :  { %910 = vmatpush3.msra.mxu1 %v405_v18  ;;  %v610_v18 = vld [vmem:[#allocation8 + $0x178] sm:$0xff] }
 0x14e   :  { %911 = vmatprep.subr.mxu1 %v1153_v0 }
 0x14f   :  { %912 = vmatpush3.msra.mxu1 %v404_v19  ;;  %v609_v19 = vld [vmem:[#allocation8 + $0x170] sm:$0xff] }
 0x150   :  { %913 = vmatprep.subr.mxu1 %v1153_v0 }
 0x151   :  { %914 = vmatpush3.msra.mxu1 %v403_v20  ;;  %v608_v20 = vld [vmem:[#allocation8 + $0x168] sm:$0xff] }
 0x152   :  { %915 = vmatprep.subr.mxu1 %v1153_v0 }
 0x153   :  { %916 = vmatpush3.msra.mxu1 %v402_v21  ;;  %v607_v21 = vld [vmem:[#allocation8 + $0x160] sm:$0xff] }
 0x154   :  { %917 = vmatprep.subr.mxu1 %v1153_v0 }
 0x155   :  { %918 = vmatpush3.msra.mxu1 %v401_v22  ;;  %v606_v22 = vld [vmem:[#allocation8 + $0x158] sm:$0xff] }
 0x156   :  { %919 = vmatprep.subr.mxu1 %v1153_v0 }
 0x157   :  { %920 = vmatpush3.msra.mxu1 %v400_v23  ;;  %v605_v23 = vld [vmem:[#allocation8 + $0x150] sm:$0xff] }
 0x158   :  { %921 = vmatprep.subr.mxu1 %v1153_v0 }
 0x159   :  { %922 = vmatpush3.msra.mxu1 %v399_v50 }
 0x15a   :  { %923 = vmatprep.subr.mxu1 %v1153_v0 }
 0x15b   :  { %924 = vmatpush3.msra.mxu1 %v398_v51  ;;  %v603_v51 = vld [vmem:[#allocation8 + $0x140] sm:$0xff] }
 0x15c   :  { %925 = vmatprep.subr.mxu1 %v1153_v0 }
 0x15d   :  { %926 = vmatpush3.msra.mxu1 %v397_v52  ;;  %v602_v52 = vld [vmem:[#allocation8 + $0x138] sm:$0xff] }
 0x15e   :  { %927 = vmatprep.subr.mxu1 %v1153_v0 }
 0x15f   :  { %928 = vmatpush3.msra.mxu1 %v396_v53  ;;  %v601_v53 = vld [vmem:[#allocation8 + $0x130] sm:$0xff] }
 0x160   :  { %929 = vmatprep.subr.mxu1 %v1153_v0 }
 0x161   :  { %930 = vmatpush3.msra.mxu1 %v395_v54  ;;  %v600_v54 = vld [vmem:[#allocation8 + $0x128] sm:$0xff] }
 0x162   :  { %931 = vmatprep.subr.mxu1 %v1153_v0 }
 0x163   :  { %932 = vmatpush3.msra.mxu1 %v394_v55  ;;  %v599_v55 = vld [vmem:[#allocation8 + $0x120] sm:$0xff] }
 0x164   :  { %933 = vmatprep.subr.mxu1 %v1153_v0 }
 0x165   :  { %934 = vmatpush3.msra.mxu1 %v393_v56  ;;  %v598_v56 = vld [vmem:[#allocation8 + $0x118] sm:$0xff] }
 0x166   :  { %935 = vmatprep.subr.mxu1 %v1153_v0 }
 0x167   :  { %936 = vmatpush3.msra.mxu1 %v392_v57  ;;  %v597_v57 = vld [vmem:[#allocation8 + $0x110] sm:$0xff] }
 0x168   :  { %937 = vmatprep.subr.mxu1 %v1153_v0 }
 0x169   :  { %938 = vmatpush3.msra.mxu1 %v391_v58  ;;  %v596_v58 = vld [vmem:[#allocation8 + $0x108] sm:$0xff] }
 0x16a   :  { %977 = vmatprep.subr.mxu1 %v1153_v0 }
 0x20a   :  { %v269_v24 = vpop.f32.mrf.mxu1 }
 0x20b   :  { %v1273_v25 = vadd.f32 %v269_v24, %v1210_v5  ;;  %v604_v24 = vld [vmem:[#allocation8 + $0x148] sm:$0xff] }
 0x20c   :  { %v871_v26 = vpop.f32.mrf.mxu1 }
 0x20d   :  { %v274_v27 = vrot.slane %v1273_v25, 4 }
 0x20f   :  { %v275_v28 = vadd.f32 %v274_v27, %v1273_v25 }
 0x211   :  { %v276_v29 = vrot.slane %v275_v28, 2 }
 0x213   :  { %v277_v30 = vadd.f32 %v276_v29, %v275_v28 }
 0x215   :  { %v278_v31 = vrot.slane %v277_v30, 1 }
 0x217   :  { %v279_v32 = vadd.f32 %v278_v31, %v277_v30 }
 0x219   :  { %v280_v33 = vmul.f32 0.125, %v279_v32 }
 0x21b   :  { %v281_v34 = vsub.f32 %v1273_v25, %v280_v33 }
 0x21d   :  { %v282_v35 = vmul.f32 %v281_v34, %v281_v34 }
 0x21f   :  { %v283_v36 = vrot.slane %v282_v35, 4 }
 0x221   :  { %v284_v37 = vadd.f32 %v283_v36, %v282_v35 }
 0x223   :  { %v285_v38 = vrot.slane %v284_v37, 2 }
 0x225   :  { %v286_v39 = vadd.f32 %v285_v38, %v284_v37 }
 0x227   :  { %v287_v40 = vrot.slane %v286_v39, 1 }
 0x229   :  { %v288_v5 = vadd.f32 %v287_v40, %v286_v39 }
 0x22b   :  { %v289_v41 = vmul.f32 0.14285715, %v288_v5 }
 0x22d   :  { %1027 = vrsqrt.f32 %v289_v41  ;;  %vm292_vm3 = vcmp.eq.f32.partialorder %v289_v41, inf  ;;  %v295_v44 = vand.u32 2147483648, %v289_v41  ;;  %vm294_vm4 = vcmp.eq.f32.partialorder %v289_v41, 0.0 }
 0x23a   :  { %v1028_v42 = vpop.eup %1027 }
 0x23b   :  { %v291_v43 = vmul.f32 %v1028_v42, %v289_v41 }
 0x23d   :  { %v293_v45 = vsel %vm292_vm3, %v289_v41, %v291_v43 }
 0x23e   :  { %v296_v46 = vsel %vm294_vm4, %v295_v44, %v293_v45 }
 0x23f   :  { %v297_v47 = vadd.f32 1e-05, %v296_v46 }
 0x241   :  { %1029 = vrcp.f32 %v297_v47 }
 0x24e   :  { %v1030_v48 = vpop.eup %1029 }
 0x24f   :  { %v299_v49 = vmul.f32 %v1030_v48, %v281_v34 }
 0x251   :  { %905 = vmatmul.mubr.f32.vlgmr.msra.gmra.mxu0 %v299_v49 }
 0x252   :  { %974 = vmatprep.mubr.msk.f32.mxu0 %vm1154_vm0, %v1153_v0  ;;  %943 = vmatpush3.msra.mxu0 %v520_v1 }
 0x253   :  { %944 = vmatprep.subr.mxu0 %v1153_v0 }
 0x254   :  { %945 = vmatpush3.msra.mxu0 %v519_v2 }
 0x255   :  { %946 = vmatprep.subr.mxu0 %v1153_v0 }
 0x256   :  { %947 = vmatpush3.msra.mxu0 %v518_v3 }
 0x257   :  { %948 = vmatprep.subr.mxu0 %v1153_v0 }
 0x258   :  { %949 = vmatpush3.msra.mxu0 %v517_v4 }
 0x259   :  { %950 = vmatprep.subr.mxu0 %v1153_v0 }
 0x25a   :  { %951 = vmatpush3.msra.mxu0 %v516_v6 }
 0x25b   :  { %952 = vmatprep.subr.mxu0 %v1153_v0 }
 0x25c   :  { %953 = vmatpush3.msra.mxu0 %v515_v7 }
 0x25d   :  { %954 = vmatprep.subr.mxu0 %v1153_v0 }
 0x25e   :  { %955 = vmatpush3.msra.mxu0 %v514_v8 }
 0x25f   :  { %956 = vmatprep.subr.mxu0 %v1153_v0 }
 0x260   :  { %957 = vmatpush3.msra.mxu0 %v513_v9 }
 0x261   :  { %958 = vmatprep.subr.mxu0 %v1153_v0 }
 0x262   :  { %959 = vmatpush3.msra.mxu0 %v512_v10 }
 0x263   :  { %960 = vmatprep.subr.mxu0 %v1153_v0 }
 0x264   :  { %961 = vmatpush3.msra.mxu0 %v511_v11 }
 0x265   :  { %962 = vmatprep.subr.mxu0 %v1153_v0 }
 0x266   :  { %963 = vmatpush3.msra.mxu0 %v510_v12 }
 0x267   :  { %964 = vmatprep.subr.mxu0 %v1153_v0 }
 0x268   :  { %965 = vmatpush3.msra.mxu0 %v509_v13 }
 0x269   :  { %966 = vmatprep.subr.mxu0 %v1153_v0 }
 0x26a   :  { %967 = vmatpush3.msra.mxu0 %v508_v14 }
 0x26b   :  { %968 = vmatprep.subr.mxu0 %v1153_v0 }
 0x26c   :  { %969 = vmatpush3.msra.mxu0 %v507_v15 }
 0x26d   :  { %970 = vmatprep.subr.mxu0 %v1153_v0 }
 0x26e   :  { %971 = vmatpush3.msra.mxu0 %v506_v16 }
 0x26f   :  { %972 = vmatprep.subr.mxu0 %v1153_v0 }
 0x270   :  { %973 = vmatpush3.msra.mxu0 %v505_v17 }
 0x311   :  { %v385_v60 = vpop.f32.mrf.mxu0 }
 0x312   :  { %v386_v61 = vadd.f32 %v385_v60, %v318_v59  ;;  %v595_v59 = vld [vmem:[#allocation8 + $0x100] sm:$0xff]  ;;  %v522_v60 = vld [vmem:[#allocation7 + $0x10] sm:$0xff] }
 0x313   :  { %v906_v62 = vpop.f32.mrf.mxu0 }
 0x314   :  { %1031 = vtanh.f32 %v386_v61 }
 0x321   :  { %v1032_v63 = vpop.eup %1031 }
 0x322   :  { %940 = vmatmul.mubr.f32.vlgmr.msra.gmra.mxu1 %v1032_v63 }
 0x323   :  { %1009 = vmatprep.mubr.msk.f32.mxu1 %vm1154_vm0, %v1153_v0  ;;  %978 = vmatpush3.msra.mxu1 %v610_v18 }
 0x324   :  { %979 = vmatprep.subr.mxu1 %v1153_v0 }
 0x325   :  { %980 = vmatpush3.msra.mxu1 %v609_v19 }
 0x326   :  { %981 = vmatprep.subr.mxu1 %v1153_v0 }
 0x327   :  { %982 = vmatpush3.msra.mxu1 %v608_v20 }
 0x328   :  { %983 = vmatprep.subr.mxu1 %v1153_v0 }
 0x329   :  { %984 = vmatpush3.msra.mxu1 %v607_v21 }
 0x32a   :  { %985 = vmatprep.subr.mxu1 %v1153_v0 }
 0x32b   :  { %986 = vmatpush3.msra.mxu1 %v606_v22 }
 0x32c   :  { %987 = vmatprep.subr.mxu1 %v1153_v0 }
 0x32d   :  { %988 = vmatpush3.msra.mxu1 %v605_v23 }
 0x32e   :  { %989 = vmatprep.subr.mxu1 %v1153_v0 }
 0x32f   :  { %990 = vmatpush3.msra.mxu1 %v604_v24 }
 0x330   :  { %991 = vmatprep.subr.mxu1 %v1153_v0 }
 0x331   :  { %992 = vmatpush3.msra.mxu1 %v603_v51 }
 0x332   :  { %993 = vmatprep.subr.mxu1 %v1153_v0 }
 0x333   :  { %994 = vmatpush3.msra.mxu1 %v602_v52 }
 0x334   :  { %995 = vmatprep.subr.mxu1 %v1153_v0 }
 0x335   :  { %996 = vmatpush3.msra.mxu1 %v601_v53 }
 0x336   :  { %997 = vmatprep.subr.mxu1 %v1153_v0 }
 0x337   :  { %998 = vmatpush3.msra.mxu1 %v600_v54 }
 0x338   :  { %999 = vmatprep.subr.mxu1 %v1153_v0 }
 0x339   :  { %1000 = vmatpush3.msra.mxu1 %v599_v55 }
 0x33a   :  { %1001 = vmatprep.subr.mxu1 %v1153_v0 }
 0x33b   :  { %1002 = vmatpush3.msra.mxu1 %v598_v56 }
 0x33c   :  { %1003 = vmatprep.subr.mxu1 %v1153_v0 }
 0x33d   :  { %1004 = vmatpush3.msra.mxu1 %v597_v57 }
 0x33e   :  { %1005 = vmatprep.subr.mxu1 %v1153_v0 }
 0x33f   :  { %1006 = vmatpush3.msra.mxu1 %v596_v58 }
 0x340   :  { %1007 = vmatprep.subr.mxu1 %v1153_v0 }
 0x341   :  { %1008 = vmatpush3.msra.mxu1 %v595_v59 }
 0x3e2   :  { %v473_v26 = vpop.f32.mrf.mxu1 }
 0x3e3   :  { %v1314_v27 = vadd.f32 %v473_v26, %v1273_v25 }
 0x3e4   :  { %v941_v28 = vpop.f32.mrf.mxu1 }
 0x3e5   :  { %v478_v29 = vrot.slane %v1314_v27, 4 }
 0x3e7   :  { %v479_v30 = vadd.f32 %v478_v29, %v1314_v27 }
 0x3e9   :  { %v480_v31 = vrot.slane %v479_v30, 2 }
 0x3eb   :  { %v481_v32 = vadd.f32 %v480_v31, %v479_v30 }
 0x3ed   :  { %v482_v33 = vrot.slane %v481_v32, 1 }
 0x3ef   :  { %v483_v34 = vadd.f32 %v482_v33, %v481_v32 }
 0x3f1   :  { %v484_v35 = vmul.f32 0.125, %v483_v34 }
 0x3f3   :  { %v485_v36 = vsub.f32 %v1314_v27, %v484_v35 }
 0x3f5   :  { %v486_v37 = vmul.f32 %v485_v36, %v485_v36 }
 0x3f7   :  { %v487_v38 = vrot.slane %v486_v37, 4 }
 0x3f9   :  { %v488_v39 = vadd.f32 %v487_v38, %v486_v37 }
 0x3fb   :  { %v489_v40 = vrot.slane %v488_v39, 2 }
 0x3fd   :  { %v490_v5 = vadd.f32 %v489_v40, %v488_v39 }
 0x3ff   :  { %v491_v41 = vrot.slane %v490_v5, 1 }
 0x401   :  { %v492_v25 = vadd.f32 %v491_v41, %v490_v5 }
 0x403   :  { %v493_v42 = vmul.f32 0.14285715, %v492_v25 }
 0x405   :  { %1033 = vrsqrt.f32 %v493_v42  ;;  %vm496_vm5 = vcmp.eq.f32.partialorder %v493_v42, inf  ;;  %v499_v45 = vand.u32 2147483648, %v493_v42  ;;  %vm498_vm6 = vcmp.eq.f32.partialorder %v493_v42, 0.0 }
 0x412   :  { %v1034_v43 = vpop.eup %1033 }
 0x413   :  { %v495_v44 = vmul.f32 %v1034_v43, %v493_v42 }
 0x415   :  { %v497_v46 = vsel %vm496_vm5, %v493_v42, %v495_v44 }
 0x416   :  { %v500_v47 = vsel %vm498_vm6, %v499_v45, %v497_v46 }
 0x417   :  { %v501_v48 = vadd.f32 1e-05, %v500_v47 }
 0x419   :  { %1035 = vrcp.f32 %v501_v48 }
 0x426   :  { %v1036_v49 = vpop.eup %1035 }
 0x427   :  { %v503_v50 = vmul.f32 %v1036_v49, %v485_v36 }
 0x429   :  { %975 = vmatmul.mubr.f32.vlgmr.msra.gmra.mxu0 %v503_v50 }
 0x4e9   :  { %v589_v61 = vpop.f32.mrf.mxu0 }
 0x4ea   :  { %v590_v62 = vadd.f32 %v589_v61, %v522_v60 }
 0x4eb   :  { %v976_v63 = vpop.f32.mrf.mxu0 }
 0x4ec   :  { %1037 = vtanh.f32 %v590_v62 }
 0x4f9   :  { %v1038_v1 = vpop.eup %1037 }
 0x4fa   :  { %1010 = vmatmul.mubr.f32.vlgmr.msra.gmra.mxu1 %v1038_v1 }
 0x5ba   :  { %v677_v2 = vpop.f32.mrf.mxu1 }
 0x5bb   :  { %v681_v3 = vadd.f32 %v677_v2, %v1314_v27 }
 0x5bc   :  { %v1011_v4 = vpop.f32.mrf.mxu1 }
 0x5bd   :  { %682 = vst [vmem:[#allocation10] sm:$0xff] %v681_v3 }
 0x5be   :  { %1130 = shalt.err (!%p1127_p10)
}
 0x5bf   :  { %692 = dma.vmem_to_hbm [thread:$0]  %s690_s3, 128, %s1335_s4, [#allocation4]  }
 0x5c0   :  { %1145 = dma.done.wait [#allocation4], 128  }
 0x5c1   :  { %1146 = vsyncadd [#allocation4], 4294967168 }
 0x5c2   :  { %696 = vsyncpa [#allocation3], 1 }
 0x5c3   :  { %697 = vsyncpa [#allocation6], 1 }
 0x5c4   :  { %698 = vsyncpa [#allocation9], 1 }
 0x5c5   :  { %699 = vsyncpa [#allocation4], 1 }

</bundles_post_ra>
